<compile_context>
chip_gen: v6e
topology: v6e:2x2x1
jax: 0.10.0
libtpu: 0.0.40
codegen_flags: <defaults>
</compile_context>

<pallas_src>
import jax
import jax.numpy as jnp
from jax.experimental import pallas as pl
from jax.experimental.pallas import tpu as pltpu


def _round_up(x, m):
    return ((x + m - 1) // m) * m


def _sigmoid(x):
    # Exact sigmoid: exp() runs on the EUP; the single divide stays on the VPU.
    # NOTE: pl.reciprocal(..., approx=True) would move the divide to the EUP,
    # but its ~2^-12 relative error compounds over 5 layers and loosens
    # validation; the divide is not the bottleneck here.
    return 1.0 / (1.0 + jnp.exp(-x))


def ann_kernel(x_ref,
               w1, b1, w2, b2, w3, b3, w4, b4, w5, b5_smem,
               o_ref):
    # Feature-major layout: x_ref is (input_dim, TILE_B), batch on lanes.
    h = x_ref[...]  # f32

    def layer(h, w_ref, b_ref):
        w = w_ref[...]                                   # (out, in), f32 or bf16
        acc = jnp.dot(w, h.astype(w.dtype),              # MXU, f32 accumulate
                      preferred_element_type=jnp.float32)
        return _sigmoid(acc + b_ref[...])                # (out,1) bcasts on lanes

    h = layer(h, w1, b1)     # 5   -> 128   (f32; K=5 is negligible FLOPs)
    h = layer(h, w2, b2)     # 128 -> 128   (bf16 MXU)
    h = layer(h, w3, b3)     # 128 -> 64
    h = layer(h, w4, b4)     # 64  -> 32
    # Output layer: 32 -> 1, produced directly as a lane-dense (1, TILE_B) row.
    z = jnp.dot(w5[...], h.astype(w5[...].dtype),
                preferred_element_type=jnp.float32)
    o_ref[...] = _sigmoid(z + b5_smem[0, 0])             # scalar bias from SMEM


def ann_forward(x, params, *, tile_b=2048):
    """x: (B, input_dim) f32. params: list of (W (out,in), b (out,1))."""
    B, in_dim = x.shape
    assert in_dim == params[0][0].shape[1]

    # Clamp the batch tile to the 128-aligned padded batch (tiny batches run
    # as a single grid step); tile_b default is a multiple of 256 for the MXU.
    tile_b = min(tile_b, max(128, _round_up(B, 128)))
    b_pad = _round_up(B, tile_b)

    # Layout plumbing: pad + transpose so batch rows sit on the lane axis and
    # the kernel sees a lane-dense (input_dim, TILE_B) slab.
    x_t = jnp.zeros((in_dim, b_pad), jnp.float32).at[:, :B].set(x.T)

    flat = []
    for w, b in params:
        flat.extend([w, b])

    in_specs = [pl.BlockSpec((in_dim, tile_b), lambda i: (0, i))]
    for idx, a in enumerate(flat):
        if idx == len(flat) - 1:
            # b5 is a true scalar -> SMEM (avoids a padded, double-buffered
            # VMEM tile for a single float).
            in_specs.append(pl.BlockSpec(memory_space=pltpu.MemorySpace.SMEM))
        else:
            # Resident weight/bias: full block, constant index map -> DMA'd
            # once, reused across all grid steps.
            in_specs.append(pl.BlockSpec(a.shape, lambda i: (0, 0)))

    out = pl.pallas_call(
        ann_kernel,
        out_shape=jax.ShapeDtypeStruct((1, b_pad), jnp.float32),
        grid=(b_pad // tile_b,),
        in_specs=in_specs,
        out_specs=pl.BlockSpec((1, tile_b), lambda i: (0, i)),
        compiler_params=pltpu.CompilerParams(
            dimension_semantics=("parallel",),   # shard batch tiles over v7x's 2 TCs
            vmem_limit_bytes=32 * 1024 * 1024,   # explicit; ~4-8 MiB actually used
        ),
    )(x_t, *flat)
    return out[0, :B].reshape(B, 1)


def init_params(key, dims):
    """torch.nn.Linear-style init: U(+-1/sqrt(fan_in)); W stored (out, in),
    bias stored as a column (out, 1) for the feature-major kernel layout."""
    params = []
    for i in range(len(dims) - 1):
        fan_in, fan_out = dims[i], dims[i + 1]
        key, kw, kb = jax.random.split(key, 3)
        bound = 1.0 / jnp.sqrt(jnp.float32(fan_in))
        w = jax.random.uniform(kw, (fan_out, fan_in), jnp.float32, -bound, bound)
        b = jax.random.uniform(kb, (fan_out, 1), jnp.float32, -bound, bound)
        params.append((w, b))
    return params


def prepare_params(params, compute_dtype=jnp.bfloat16):
    """Cast the MXU-friendly layers (2..5) to bf16 for v6e/v7x; layer 1
    (K=input_dim=5) and all biases stay f32."""
    prepped = []
    for idx, (w, b) in enumerate(params):
        dt = jnp.float32 if idx == 0 else compute_dtype
        prepped.append((w.astype(dt), b.astype(jnp.float32)))
    return prepped


def ann_reference(x, params):
    """Pure-JAX reference with the same per-layer dtype rounding as the kernel."""
    h = x.astype(jnp.float32)
    for w, b in params:
        hc = h.astype(w.dtype).astype(jnp.float32)
        wc = w.astype(jnp.float32)
        z = jnp.dot(hc, wc.T, precision=jax.lax.Precision.HIGHEST) + b.reshape(1, -1)
        h = jax.nn.sigmoid(z)
    return h


if __name__ == "__main__":
    input_dim = 5
    hidden_dim = [128, 128, 64, 32]
    dims = [input_dim] + hidden_dim + [1]

    key = jax.random.PRNGKey(0)
    key, kx, kx2 = jax.random.split(key, 3)

    params = prepare_params(init_params(key, dims))

    # Small demo batch.
    B = 8
    x = jax.random.normal(kx, (B, input_dim), jnp.float32)
    out = jax.block_until_ready(ann_forward(x, params))
    ref = ann_reference(x, params)
    assert out.shape == (B, 1), out.shape
    assert jnp.allclose(out, ref, atol=1e-3, rtol=1e-3), (out, ref)

    # Exercise the batch grid + padding path (3 grid steps, B % tile_b != 0,
    # resident weights reused across steps).
    B2 = 300
    x2 = jax.random.normal(kx2, (B2, input_dim), jnp.float32)
    out2 = jax.block_until_ready(ann_forward(x2, params, tile_b=128))
    ref2 = ann_reference(x2, params)
    assert out2.shape == (B2, 1), out2.shape
    assert jnp.allclose(out2, ref2, atol=1e-3, rtol=1e-3), (out2, ref2)

    print("KERNEL_OK")
</pallas_src>

<mosaic_0001>
module attributes {stable_mosaic.version = 11 : i64} {
  func.func @ann_kernel(%arg0: i32, %arg1: memref<5x128xf32, #tpu.memory_space<vmem>>, %arg2: memref<128x5xf32, #tpu.memory_space<vmem>>, %arg3: memref<128x1xf32, #tpu.memory_space<vmem>>, %arg4: memref<128x128xbf16, #tpu.memory_space<vmem>>, %arg5: memref<128x1xf32, #tpu.memory_space<vmem>>, %arg6: memref<64x128xbf16, #tpu.memory_space<vmem>>, %arg7: memref<64x1xf32, #tpu.memory_space<vmem>>, %arg8: memref<32x64xbf16, #tpu.memory_space<vmem>>, %arg9: memref<32x1xf32, #tpu.memory_space<vmem>>, %arg10: memref<1x32xbf16, #tpu.memory_space<vmem>>, %arg11: memref<1x1xf32, #tpu.memory_space<smem>>, %arg12: memref<1x128xf32, #tpu.memory_space<vmem>>) attributes {dimension_semantics = [#tpu.dimension_semantics<parallel>], iteration_bounds = array<i64: 1>, scalar_prefetch = 0 : i64, scratch_operands = 0 : i64, tpu.core_type = #tpu.core_type<tc>, window_params = [{transform_indices = @transform_0, window_bounds = array<i64: 5, 128>}, {pipeline_mode = #tpu.pipeline_mode<synchronous>, transform_indices = @transform_1, window_bounds = array<i64: 128, 5>}, {pipeline_mode = #tpu.pipeline_mode<synchronous>, transform_indices = @transform_2, window_bounds = array<i64: 128, 1>}, {pipeline_mode = #tpu.pipeline_mode<synchronous>, transform_indices = @transform_3, window_bounds = array<i64: 128, 128>}, {pipeline_mode = #tpu.pipeline_mode<synchronous>, transform_indices = @transform_4, window_bounds = array<i64: 128, 1>}, {pipeline_mode = #tpu.pipeline_mode<synchronous>, transform_indices = @transform_5, window_bounds = array<i64: 64, 128>}, {pipeline_mode = #tpu.pipeline_mode<synchronous>, transform_indices = @transform_6, window_bounds = array<i64: 64, 1>}, {pipeline_mode = #tpu.pipeline_mode<synchronous>, transform_indices = @transform_7, window_bounds = array<i64: 32, 64>}, {pipeline_mode = #tpu.pipeline_mode<synchronous>, transform_indices = @transform_8, window_bounds = array<i64: 32, 1>}, {pipeline_mode = #tpu.pipeline_mode<synchronous>, transform_indices = @transform_9, window_bounds = array<i64: 1, 32>}, {transform_indices = @transform_10, window_bounds = array<i64: 1, 1>}, {transform_indices = @transform_11, window_bounds = array<i64: 1, 128>}]} {
    %c0 = arith.constant 0 : index
    %c0_0 = arith.constant 0 : index
    %0 = vector.load %arg1[%c0, %c0_0] : memref<5x128xf32, #tpu.memory_space<vmem>>, vector<5x128xf32>
    %c0_1 = arith.constant 0 : index
    %c0_2 = arith.constant 0 : index
    %1 = vector.load %arg2[%c0_1, %c0_2] : memref<128x5xf32, #tpu.memory_space<vmem>>, vector<128x5xf32>
    %cst = arith.constant dense<0.000000e+00> : vector<128x128xf32>
    %2 = tpu.matmul %1, %0, %cst {dimension_numbers = #tpu.dot_dimension_numbers<[1], [0], [0], [1], [0, 0, 1, 1], [], []>} : vector<128x5xf32>, vector<5x128xf32>, vector<128x128xf32> -> vector<128x128xf32>
    %c0_3 = arith.constant 0 : index
    %c0_4 = arith.constant 0 : index
    %3 = vector.load %arg3[%c0_3, %c0_4] : memref<128x1xf32, #tpu.memory_space<vmem>>, vector<128x1xf32>
    %4 = vector.broadcast %3 : vector<128x1xf32> to vector<128x128xf32>
    %5 = arith.addf %2, %4 : vector<128x128xf32>
    %cst_5 = arith.constant 0.000000e+00 : f32
    %6 = vector.broadcast %cst_5 : f32 to vector<128x128xf32>
    %7 = arith.subf %6, %5 : vector<128x128xf32>
    %8 = math.exp %7 : vector<128x128xf32>
    %cst_6 = arith.constant 1.000000e+00 : f32
    %9 = vector.broadcast %cst_6 : f32 to vector<128x128xf32>
    %10 = arith.addf %9, %8 : vector<128x128xf32>
    %cst_7 = arith.constant 1.000000e+00 : f32
    %11 = vector.broadcast %cst_7 : f32 to vector<128x128xf32>
    %12 = arith.divf %11, %10 : vector<128x128xf32>
    %c0_8 = arith.constant 0 : index
    %c0_9 = arith.constant 0 : index
    %13 = vector.load %arg4[%c0_8, %c0_9] : memref<128x128xbf16, #tpu.memory_space<vmem>>, vector<128x128xbf16>
    %14 = arith.truncf %12 : vector<128x128xf32> to vector<128x128xbf16>
    %cst_10 = arith.constant dense<0.000000e+00> : vector<128x128xf32>
    %15 = tpu.matmul %13, %14, %cst_10 {dimension_numbers = #tpu.dot_dimension_numbers<[1], [0], [0], [1], [0, 0, 1, 1], [], []>} : vector<128x128xbf16>, vector<128x128xbf16>, vector<128x128xf32> -> vector<128x128xf32>
    %c0_11 = arith.constant 0 : index
    %c0_12 = arith.constant 0 : index
    %16 = vector.load %arg5[%c0_11, %c0_12] : memref<128x1xf32, #tpu.memory_space<vmem>>, vector<128x1xf32>
    %17 = vector.broadcast %16 : vector<128x1xf32> to vector<128x128xf32>
    %18 = arith.addf %15, %17 : vector<128x128xf32>
    %cst_13 = arith.constant 0.000000e+00 : f32
    %19 = vector.broadcast %cst_13 : f32 to vector<128x128xf32>
    %20 = arith.subf %19, %18 : vector<128x128xf32>
    %21 = math.exp %20 : vector<128x128xf32>
    %cst_14 = arith.constant 1.000000e+00 : f32
    %22 = vector.broadcast %cst_14 : f32 to vector<128x128xf32>
    %23 = arith.addf %22, %21 : vector<128x128xf32>
    %cst_15 = arith.constant 1.000000e+00 : f32
    %24 = vector.broadcast %cst_15 : f32 to vector<128x128xf32>
    %25 = arith.divf %24, %23 : vector<128x128xf32>
    %c0_16 = arith.constant 0 : index
    %c0_17 = arith.constant 0 : index
    %26 = vector.load %arg6[%c0_16, %c0_17] : memref<64x128xbf16, #tpu.memory_space<vmem>>, vector<64x128xbf16>
    %27 = arith.truncf %25 : vector<128x128xf32> to vector<128x128xbf16>
    %cst_18 = arith.constant dense<0.000000e+00> : vector<64x128xf32>
    %28 = tpu.matmul %26, %27, %cst_18 {dimension_numbers = #tpu.dot_dimension_numbers<[1], [0], [0], [1], [0, 0, 1, 1], [], []>} : vector<64x128xbf16>, vector<128x128xbf16>, vector<64x128xf32> -> vector<64x128xf32>
    %c0_19 = arith.constant 0 : index
    %c0_20 = arith.constant 0 : index
    %29 = vector.load %arg7[%c0_19, %c0_20] : memref<64x1xf32, #tpu.memory_space<vmem>>, vector<64x1xf32>
    %30 = vector.broadcast %29 : vector<64x1xf32> to vector<64x128xf32>
    %31 = arith.addf %28, %30 : vector<64x128xf32>
    %cst_21 = arith.constant 0.000000e+00 : f32
    %32 = vector.broadcast %cst_21 : f32 to vector<64x128xf32>
    %33 = arith.subf %32, %31 : vector<64x128xf32>
    %34 = math.exp %33 : vector<64x128xf32>
    %cst_22 = arith.constant 1.000000e+00 : f32
    %35 = vector.broadcast %cst_22 : f32 to vector<64x128xf32>
    %36 = arith.addf %35, %34 : vector<64x128xf32>
    %cst_23 = arith.constant 1.000000e+00 : f32
    %37 = vector.broadcast %cst_23 : f32 to vector<64x128xf32>
    %38 = arith.divf %37, %36 : vector<64x128xf32>
    %c0_24 = arith.constant 0 : index
    %c0_25 = arith.constant 0 : index
    %39 = vector.load %arg8[%c0_24, %c0_25] : memref<32x64xbf16, #tpu.memory_space<vmem>>, vector<32x64xbf16>
    %40 = arith.truncf %38 : vector<64x128xf32> to vector<64x128xbf16>
    %cst_26 = arith.constant dense<0.000000e+00> : vector<32x128xf32>
    %41 = tpu.matmul %39, %40, %cst_26 {dimension_numbers = #tpu.dot_dimension_numbers<[1], [0], [0], [1], [0, 0, 1, 1], [], []>} : vector<32x64xbf16>, vector<64x128xbf16>, vector<32x128xf32> -> vector<32x128xf32>
    %c0_27 = arith.constant 0 : index
    %c0_28 = arith.constant 0 : index
    %42 = vector.load %arg9[%c0_27, %c0_28] : memref<32x1xf32, #tpu.memory_space<vmem>>, vector<32x1xf32>
    %43 = vector.broadcast %42 : vector<32x1xf32> to vector<32x128xf32>
    %44 = arith.addf %41, %43 : vector<32x128xf32>
    %cst_29 = arith.constant 0.000000e+00 : f32
    %45 = vector.broadcast %cst_29 : f32 to vector<32x128xf32>
    %46 = arith.subf %45, %44 : vector<32x128xf32>
    %47 = math.exp %46 : vector<32x128xf32>
    %cst_30 = arith.constant 1.000000e+00 : f32
    %48 = vector.broadcast %cst_30 : f32 to vector<32x128xf32>
    %49 = arith.addf %48, %47 : vector<32x128xf32>
    %cst_31 = arith.constant 1.000000e+00 : f32
    %50 = vector.broadcast %cst_31 : f32 to vector<32x128xf32>
    %51 = arith.divf %50, %49 : vector<32x128xf32>
    %c0_32 = arith.constant 0 : index
    %c0_33 = arith.constant 0 : index
    %52 = vector.load %arg10[%c0_32, %c0_33] : memref<1x32xbf16, #tpu.memory_space<vmem>>, vector<1x32xbf16>
    %53 = arith.truncf %51 : vector<32x128xf32> to vector<32x128xbf16>
    %cst_34 = arith.constant dense<0.000000e+00> : vector<1x128xf32>
    %54 = tpu.matmul %52, %53, %cst_34 {dimension_numbers = #tpu.dot_dimension_numbers<[1], [0], [0], [1], [0, 0, 1, 1], [], []>} : vector<1x32xbf16>, vector<32x128xbf16>, vector<1x128xf32> -> vector<1x128xf32>
    %c0_35 = arith.constant 0 : index
    %c0_36 = arith.constant 0 : index
    %55 = memref.load %arg11[%c0_35, %c0_36] : memref<1x1xf32, #tpu.memory_space<smem>>
    %56 = vector.broadcast %55 : f32 to vector<1x128xf32>
    %57 = arith.addf %54, %56 : vector<1x128xf32>
    %cst_37 = arith.constant 0.000000e+00 : f32
    %58 = vector.broadcast %cst_37 : f32 to vector<1x128xf32>
    %59 = arith.subf %58, %57 : vector<1x128xf32>
    %60 = math.exp %59 : vector<1x128xf32>
    %cst_38 = arith.constant 1.000000e+00 : f32
    %61 = vector.broadcast %cst_38 : f32 to vector<1x128xf32>
    %62 = arith.addf %61, %60 : vector<1x128xf32>
    %cst_39 = arith.constant 1.000000e+00 : f32
    %63 = vector.broadcast %cst_39 : f32 to vector<1x128xf32>
    %64 = arith.divf %63, %62 : vector<1x128xf32>
    %c0_40 = arith.constant 0 : index
    %c0_41 = arith.constant 0 : index
    %65 = vector.load %arg12[%c0_40, %c0_41] : memref<1x128xf32, #tpu.memory_space<vmem>>, vector<1x128xf32>
    tpu.vector_store %arg12[%c0_40, %c0_41], %64 {strides = array<i32>} : memref<1x128xf32, #tpu.memory_space<vmem>>, vector<1x128xf32>,
    return
  }
  func.func @transform_0(%arg0: i32) -> (i32, i32) {
    %c0_i32 = arith.constant 0 : i32
    %c0_i32_0 = arith.constant 0 : i32
    return %c0_i32, %arg0 : i32, i32
  }
  func.func @transform_1(%arg0: i32) -> (i32, i32) {
    %c0_i32 = arith.constant 0 : i32
    %c0_i32_0 = arith.constant 0 : i32
    %c0_i32_1 = arith.constant 0 : i32
    return %c0_i32, %c0_i32_0 : i32, i32
  }
  func.func @transform_2(%arg0: i32) -> (i32, i32) {
    %c0_i32 = arith.constant 0 : i32
    %c0_i32_0 = arith.constant 0 : i32
    %c0_i32_1 = arith.constant 0 : i32
    return %c0_i32, %c0_i32_0 : i32, i32
  }
  func.func @transform_3(%arg0: i32) -> (i32, i32) {
    %c0_i32 = arith.constant 0 : i32
    %c0_i32_0 = arith.constant 0 : i32
    %c0_i32_1 = arith.constant 0 : i32
    return %c0_i32, %c0_i32_0 : i32, i32
  }
  func.func @transform_4(%arg0: i32) -> (i32, i32) {
    %c0_i32 = arith.constant 0 : i32
    %c0_i32_0 = arith.constant 0 : i32
    %c0_i32_1 = arith.constant 0 : i32
    return %c0_i32, %c0_i32_0 : i32, i32
  }
  func.func @transform_5(%arg0: i32) -> (i32, i32) {
    %c0_i32 = arith.constant 0 : i32
    %c0_i32_0 = arith.constant 0 : i32
    %c0_i32_1 = arith.constant 0 : i32
    return %c0_i32, %c0_i32_0 : i32, i32
  }
  func.func @transform_6(%arg0: i32) -> (i32, i32) {
    %c0_i32 = arith.constant 0 : i32
    %c0_i32_0 = arith.constant 0 : i32
    %c0_i32_1 = arith.constant 0 : i32
    return %c0_i32, %c0_i32_0 : i32, i32
  }
  func.func @transform_7(%arg0: i32) -> (i32, i32) {
    %c0_i32 = arith.constant 0 : i32
    %c0_i32_0 = arith.constant 0 : i32
    %c0_i32_1 = arith.constant 0 : i32
    return %c0_i32, %c0_i32_0 : i32, i32
  }
  func.func @transform_8(%arg0: i32) -> (i32, i32) {
    %c0_i32 = arith.constant 0 : i32
    %c0_i32_0 = arith.constant 0 : i32
    %c0_i32_1 = arith.constant 0 : i32
    return %c0_i32, %c0_i32_0 : i32, i32
  }
  func.func @transform_9(%arg0: i32) -> (i32, i32) {
    %c0_i32 = arith.constant 0 : i32
    %c0_i32_0 = arith.constant 0 : i32
    %c0_i32_1 = arith.constant 0 : i32
    return %c0_i32, %c0_i32_0 : i32, i32
  }
  func.func @transform_10(%arg0: i32) -> (i32, i32) {
    %c0_i32 = arith.constant 0 : i32
    %c0_i32_0 = arith.constant 0 : i32
    %c0_i32_1 = arith.constant 0 : i32
    return %c0_i32, %c0_i32_0 : i32, i32
  }
  func.func @transform_11(%arg0: i32) -> (i32, i32) {
    %c0_i32 = arith.constant 0 : i32
    %c0_i32_0 = arith.constant 0 : i32
    return %c0_i32, %arg0 : i32, i32
  }
}

</mosaic_0001>

<bundles_post_ra>
// kernel: tpu_custom_call.1
= control target key start
LH: loop header
LB: loop body
LE: loop exit
PB: predicated region body
PF: predicated region fallthrough
CT: control target
= control target key end

     0   :  { %vm203_vm0 = vcmask 1044480   ;;  %vm154_vm1 = vcmask 39936   ;;  %v1614_v4 = vmov 0   ;;  %s1945_s0 = inlined_call_operand.vmem [shape: f32[5,128], index: 0, kind: input, shape index: {}]   ;;  %s1946_s1 = inlined_call_operand.vmem [shape: f32[128,5], index: 1, kind: input, shape index: {}]   ;;  %s1947_s2 = inlined_call_operand.vmem [shape: f32[128,1], index: 2, kind: input, shape index: {}]   ;;  %s1948_s3 = inlined_call_operand.vmem [shape: bf16[128,128], index: 3, kind: input, shape index: {}]   ;;  %s1949_s4 = inlined_call_operand.vmem [shape: f32[128,1], index: 4, kind: input, shape index: {}]   ;;  %s1950_s5 = inlined_call_operand.vmem [shape: bf16[64,128], index: 5, kind: input, shape index: {}]   ;;  %s1951_s6 = inlined_call_operand.vmem [shape: f32[64,1], index: 6, kind: input, shape index: {}]   ;;  %s1952_s7 = inlined_call_operand.vmem [shape: bf16[32,64], index: 7, kind: input, shape index: {}]   ;;  %s1953_s8 = inlined_call_operand.vmem [shape: f32[32,1], index: 8, kind: input, shape index: {}]   ;;  %s1954_s9 = inlined_call_operand.vmem [shape: bf16[1,32], index: 9, kind: input, shape index: {}]   ;;  %s1955_s10 = inlined_call_operand.<no memory space> [shape: f32[1,1], index: 10, kind: input, shape index: {}]   ;;  %s1956_s11 = inlined_call_operand.hbm [shape: f32[1,128], index: 11, kind: output, shape index: {}]  }
   0x1   :  { %v41_v0 = vld [vmem:[%s1945_s0] sm:$0x1f]  ;;  %v43_v2 = vld [vmem:[%s1946_s1 + $0x8] sm:$0xff]  ;;  %v44_v3 = vld [vmem:[%s1946_s1 + $0x10] sm:$0xff]  ;;  %1396 = vset.pattern.permute.xlu0 %v1614_v4  ;;  %1397 = vset.pattern.permute.xlu1 %v1614_v4 }
   0x2   :  { %v42_v1 = vld [vmem:[%s1946_s1] sm:$0xff]  ;;  %1290 = vmatprep.subr.msk.mxu0 %vm203_vm0, %v41_v0  ;;  %v72_v5 = vld [vmem:[%s1947_s2 + $0x70] sm:$0xff]  ;;  %v45_v7 = vld [vmem:[%s1946_s1 + $0x18] sm:$0xff] }
   0x3   :  { %1292 = vmatprep.mubr.msk.f32.mxu0 %vm154_vm1, %v42_v1  ;;  %1291 = vmatpush3.msk.msra.mxu0 %vm203_vm0, %v41_v0  ;;  %v70_v6 = vld [vmem:[%s1947_s2 + $0x60] sm:$0xff]  ;;  %v73_v8 = vld [vmem:[%s1947_s2 + $0x78] sm:$0xff]  ;;  %v71_v10 = vld [vmem:[%s1947_s2 + $0x68] sm:$0xff] }
   0x4   :  { %1293 = vmatmul.mubr.msk.f32.vlgmr.msra.gmra.mxu0 %vm154_vm1, %v43_v2  ;;  %146 = vperm.xlu0 %1396, %v72_v5   ;;  %v46_v9 = vld [vmem:[%s1946_s1 + $0x20] sm:$0xff]  ;;  %v47_v11 = vld [vmem:[%s1946_s1 + $0x28] sm:$0xff]  ;;  %v68_v12 = vld [vmem:[%s1947_s2 + $0x50] sm:$0xff] }
   0x5   :  { %1295 = vmatprep.mubr.msk.f32.mxu0 %vm154_vm1, %v44_v3  ;;  %136 = vperm.xlu1 %1397, %v70_v6   ;;  %v48_v13 = vld [vmem:[%s1946_s1 + $0x30] sm:$0xff]  ;;  %v69_v14 = vld [vmem:[%s1947_s2 + $0x58] sm:$0xff]  ;;  %v66_v16 = vld [vmem:[%s1947_s2 + $0x40] sm:$0xff] }
   0x6   :  { %v49_v15 = vld [vmem:[%s1946_s1 + $0x38] sm:$0xff]  ;;  %v50_v17 = vld [vmem:[%s1946_s1 + $0x40] sm:$0xff]  ;;  %v67_v18 = vld [vmem:[%s1947_s2 + $0x48] sm:$0xff] }
   0x7   :  { %v51_v19 = vld [vmem:[%s1946_s1 + $0x48] sm:$0xff]  ;;  %v64_v20 = vld [vmem:[%s1947_s2 + $0x30] sm:$0xff]  ;;  %v65_v22 = vld [vmem:[%s1947_s2 + $0x38] sm:$0xff] }
   0x8   :  { %1296 = vmatmul.mubr.msk.f32.gmra.mxu0 %vm154_vm1, %v45_v7  ;;  %151 = vperm.xlu0 %1396, %v73_v8   ;;  %v52_v21 = vld [vmem:[%s1946_s1 + $0x50] sm:$0xff]  ;;  %v53_v23 = vld [vmem:[%s1946_s1 + $0x58] sm:$0xff]  ;;  %v54_v24 = vld [vmem:[%s1946_s1 + $0x60] sm:$0xff] }
   0x9   :  { %1298 = vmatprep.mubr.msk.f32.mxu0 %vm154_vm1, %v46_v9  ;;  %141 = vperm.xlu1 %1397, %v71_v10   ;;  %v62_v25 = vld [vmem:[%s1947_s2 + $0x20] sm:$0xff]  ;;  %v63_v26 = vld [vmem:[%s1947_s2 + $0x28] sm:$0xff]  ;;  %v60_v28 = vld [vmem:[%s1947_s2 + $0x10] sm:$0xff] }
   0xa   :  { %v55_v27 = vld [vmem:[%s1946_s1 + $0x68] sm:$0xff]  ;;  %v56_v29 = vld [vmem:[%s1946_s1 + $0x70] sm:$0xff]  ;;  %v61_v30 = vld [vmem:[%s1947_s2 + $0x18] sm:$0xff] }
   0xb   :  { %v57_v31 = vld [vmem:[%s1946_s1 + $0x78] sm:$0xff]  ;;  %v58_v32 = vld [vmem:[%s1947_s2] sm:$0xff] }
   0xc   :  { %1299 = vmatmul.mubr.msk.f32.gmra.mxu0 %vm154_vm1, %v47_v11  ;;  %126 = vperm.xlu0 %1396, %v68_v12  }
   0xd   :  { %1301 = vmatprep.mubr.msk.f32.mxu0 %vm154_vm1, %v48_v13  ;;  %131 = vperm.xlu1 %1397, %v69_v14  }
  0x10   :  { %1302 = vmatmul.mubr.msk.f32.gmra.mxu0 %vm154_vm1, %v49_v15  ;;  %116 = vperm.xlu0 %1396, %v66_v16  }
  0x11   :  { %1304 = vmatprep.mubr.msk.f32.mxu0 %vm154_vm1, %v50_v17  ;;  %121 = vperm.xlu1 %1397, %v67_v18  }
  0x14   :  { %1305 = vmatmul.mubr.msk.f32.gmra.mxu0 %vm154_vm1, %v51_v19  ;;  %106 = vperm.xlu0 %1396, %v64_v20  }
  0x15   :  { %1307 = vmatprep.mubr.msk.f32.mxu0 %vm154_vm1, %v52_v21  ;;  %111 = vperm.xlu1 %1397, %v65_v22  }
  0x18   :  { %1308 = vmatmul.mubr.msk.f32.gmra.mxu0 %vm154_vm1, %v53_v23  ;;  %96 = vperm.xlu0 %1396, %v62_v25  }
  0x19   :  { %1310 = vmatprep.mubr.msk.f32.mxu0 %vm154_vm1, %v54_v24  ;;  %101 = vperm.xlu1 %1397, %v63_v26  }
  0x1c   :  { %1311 = vmatmul.mubr.msk.f32.gmra.mxu0 %vm154_vm1, %v55_v27  ;;  %86 = vperm.xlu0 %1396, %v60_v28  }
  0x1d   :  { %1313 = vmatprep.mubr.msk.f32.mxu0 %vm154_vm1, %v56_v29  ;;  %91 = vperm.xlu1 %1397, %v61_v30  }
  0x1e   :  { %17 = vsyncpa [#allocation4], 0  ;;  %v59_v33 = vld [vmem:[%s1947_s2 + $0x8] sm:$0xff]  ;;  %v486_v34 = vld [vmem:[%s1949_s4 + $0x70] sm:$0xff]  ;;  %vm1052_vm2 = vcmask 523264   ;;  %vm1616_vm3 = vmmov 0  }
  0x1f   :  { %v487_v35 = vld [vmem:[%s1949_s4 + $0x78] sm:$0xff]  ;;  %v484_v36 = vld [vmem:[%s1949_s4 + $0x60] sm:$0xff]  ;;  %v485_v37 = vld [vmem:[%s1949_s4 + $0x68] sm:$0xff]  ;;  %vm1137_vm4 = vcmask 261120   ;;  %s1617_s14 = smov [#allocation3]  }
  0x20   :  { %1314 = vmatmul.mubr.msk.f32.gmra.mxu0 %vm154_vm1, %v57_v31  ;;  %76 = vperm.xlu0 %1396, %v58_v32   ;;  %v482_v38 = vld [vmem:[%s1949_s4 + $0x50] sm:$0xff]  ;;  %v483_v39 = vld [vmem:[%s1949_s4 + $0x58] sm:$0xff]  ;;  %v480_v40 = vld [vmem:[%s1949_s4 + $0x40] sm:$0xff]  ;;  %s1194_s15 = sshll.u32 %s1617_s14, 4  ;;  %s1195_s15 = int_to_ptr.vmem [resolvable:$true] %s1194_s15 }
  0x21   :  { %81 = vperm.xlu1 %1397, %v59_v33   ;;  %v481_v41 = vld [vmem:[%s1949_s4 + $0x48] sm:$0xff]  ;;  %v478_v42 = vld [vmem:[%s1949_s4 + $0x30] sm:$0xff]  ;;  %v479_v43 = vld [vmem:[%s1949_s4 + $0x38] sm:$0xff]  ;;  %s1596_s16 = scalar_lea.vmem %s1195_s15, 32  ;;  %p1597_p1 = scmp.lt.s32.totalorder %s1195_s15, %s1195_s15 }
  0x22   :  { %v476_v44 = vld [vmem:[%s1949_s4 + $0x20] sm:$0xff]  ;;  %v477_v45 = vld [vmem:[%s1949_s4 + $0x28] sm:$0xff]  ;;  %v474_v46 = vld [vmem:[%s1949_s4 + $0x10] sm:$0xff] }
  0x23   :  { %v475_v47 = vld [vmem:[%s1949_s4 + $0x18] sm:$0xff]  ;;  %v472_v48 = vld [vmem:[%s1949_s4] sm:$0xff]  ;;  %v473_v49 = vld [vmem:[%s1949_s4 + $0x8] sm:$0xff] }
  0x24   :  { %560 = vperm.xlu0 %1396, %v486_v34   ;;  %v831_v50 = vld [vmem:[%s1951_s6 + $0x30] sm:$0xff]  ;;  %v832_v51 = vld [vmem:[%s1951_s6 + $0x38] sm:$0xff]  ;;  %v829_v52 = vld [vmem:[%s1951_s6 + $0x20] sm:$0xff] }
  0x25   :  { %565 = vperm.xlu1 %1397, %v487_v35   ;;  %v830_v53 = vld [vmem:[%s1951_s6 + $0x28] sm:$0xff]  ;;  %v827_v54 = vld [vmem:[%s1951_s6 + $0x10] sm:$0xff]  ;;  %v828_v55 = vld [vmem:[%s1951_s6 + $0x18] sm:$0xff] }
  0x26   :  { %v825_v56 = vld [vmem:[%s1951_s6] sm:$0xff]  ;;  %v826_v57 = vld [vmem:[%s1951_s6 + $0x8] sm:$0xff]  ;;  %v1020_v58 = vld [vmem:[%s1953_s8 + $0x10] sm:$0xff] }
  0x27   :  { %v1021_v59 = vld [vmem:[%s1953_s8 + $0x18] sm:$0xff]  ;;  %v1018_v60 = vld [vmem:[%s1953_s8] sm:$0xff]  ;;  %v1019_v61 = vld [vmem:[%s1953_s8 + $0x8] sm:$0xff] }
  0x28   :  { %550 = vperm.xlu0 %1396, %v484_v36   ;;  %v1398_v62 = vld [vmem:[%s1948_s3] sm:$0xff]  }
  0x29   :  { %555 = vperm.xlu1 %1397, %v485_v37   ;;  %1332 = vmatprep.mubr.bf16.mxu1 %v1398_v62 }
  0x2c   :  { %540 = vperm.xlu0 %1396, %v482_v38  }
  0x2d   :  { %545 = vperm.xlu1 %1397, %v483_v39  }
  0x30   :  { %530 = vperm.xlu0 %1396, %v480_v40  }
  0x31   :  { %535 = vperm.xlu1 %1397, %v481_v41  }
  0x34   :  { %520 = vperm.xlu0 %1396, %v478_v42  }
  0x35   :  { %525 = vperm.xlu1 %1397, %v479_v43  }
  0x38   :  { %510 = vperm.xlu0 %1396, %v476_v44  }
  0x39   :  { %515 = vperm.xlu1 %1397, %v477_v45  }
  0x3c   :  { %500 = vperm.xlu0 %1396, %v474_v46  }
  0x3d   :  { %505 = vperm.xlu1 %1397, %v475_v47  }
  0x40   :  { %490 = vperm.xlu0 %1396, %v472_v48  }
  0x41   :  { %495 = vperm.xlu1 %1397, %v473_v49  }
  0x44   :  { %865 = vperm.xlu0 %1396, %v831_v50  }
  0x45   :  { %870 = vperm.xlu1 %1397, %v832_v51  }
  0x48   :  { %855 = vperm.xlu0 %1396, %v829_v52  }
  0x49   :  { %860 = vperm.xlu1 %1397, %v830_v53  }
  0x4c   :  { %845 = vperm.xlu0 %1396, %v827_v54  }
  0x4d   :  { %850 = vperm.xlu1 %1397, %v828_v55  }
  0x50   :  { %835 = vperm.xlu0 %1396, %v825_v56  }
  0x51   :  { %840 = vperm.xlu1 %1397, %v826_v57  }
  0x54   :  { %1034 = vperm.xlu0 %1396, %v1020_v58  }
  0x55   :  { %1039 = vperm.xlu1 %1397, %v1021_v59  }
  0x58   :  { %1024 = vperm.xlu0 %1396, %v1018_v60  }
  0x59   :  { %1029 = vperm.xlu1 %1397, %v1019_v61  }
  0x7f   :  { %v147_v63 = vpop.permute.xlu0 %146 }
  0x80   :  { %v137_v2 = vpop.permute.xlu1 %136 }
  0x83   :  { %v152_v4 = vpop.permute.xlu0 %151 }
  0x84   :  { %v142_v7 = vpop.permute.xlu1 %141 }
  0x87   :  { %v127_v9 = vpop.permute.xlu0 %126 }
  0x88   :  { %v132_v12 = vpop.permute.xlu1 %131 }
  0x8b   :  { %v117_v14 = vpop.permute.xlu0 %116 }
  0x8c   :  { %v122_v17 = vpop.permute.xlu1 %121 }
  0x8f   :  { %v107_v19 = vpop.permute.xlu0 %106 }
  0x90   :  { %v112_v25 = vpop.permute.xlu1 %111 }
  0x93   :  { %v97_v31 = vpop.permute.xlu0 %96 }
  0x94   :  { %v102_v44 = vpop.permute.xlu1 %101 }
  0x97   :  { %v87_v48 = vpop.permute.xlu0 %86 }
  0x98   :  { %v92_v57 = vpop.permute.xlu1 %91 }
  0xc4   :  { %v1880_v0 = vpop.f32.mrf.mxu0 }
  0xc6   :  { %v1882_v1 = vpop.f32.mrf.mxu0 }
  0xc8   :  { %v1884_v3 = vpop.f32.mrf.mxu0 }
  0xca   :  { %v283_v5 = vpop.f32.mrf.mxu0 }
  0xcb   :  { %v284_v52 = vadd.f32 %v283_v5, %v87_v48 }
  0xcc   :  { %v1300_v6 = vpop.f32.mrf.mxu0 }
  0xcd   :  { %v299_v56 = vadd.f32 %v1300_v6, %v102_v44  ;;  %v354_v60 = vsub.f32 0.0, %v284_v52 }
  0xce   :  { %v293_v8 = vpop.f32.mrf.mxu0 }
  0xcf   :  { %v294_v53 = vadd.f32 %v293_v8, %v97_v31  ;;  %v372_v8 = vmul.f32 1.442695, %v354_v60 }
  0xd0   :  { %v1303_v10 = vpop.f32.mrf.mxu0 }
  0xd1   :  { %v309_v49 = vadd.f32 %v1303_v10, %v112_v25  ;;  %v356_v61 = vsub.f32 0.0, %v294_v53 }
  0xd2   :  { %v303_v11 = vpop.f32.mrf.mxu0 }
  0xd3   :  { %v304_v45 = vadd.f32 %v303_v11, %v107_v19  ;;  %v359_v58 = vsub.f32 0.0, %v309_v49  ;;  %v376_v10 = vmul.f32 1.442695, %v356_v61 }
  0xd4   :  { %v1306_v13 = vpop.f32.mrf.mxu0 }
  0xd5   :  { %v319_v38 = vadd.f32 %v1306_v13, %v122_v17  ;;  %v358_v54 = vsub.f32 0.0, %v304_v45 }
  0xd6   :  { %v313_v15 = vpop.f32.mrf.mxu0 }
  0xd7   :  { %v314_v32 = vadd.f32 %v313_v15, %v117_v14  ;;  %v361_v50 = vsub.f32 0.0, %v319_v38  ;;  %v380_v62 = vmul.f32 1.442695, %v358_v54 }
  0xd8   :  { %v1309_v16 = vpop.f32.mrf.mxu0 }
  0xd9   :  { %v329_v26 = vadd.f32 %v1309_v16, %v132_v12  ;;  %v360_v46 = vsub.f32 0.0, %v314_v32  ;;  %v386_v59 = vmul.f32 1.442695, %v361_v50 }
  0xda   :  { %v323_v18 = vpop.f32.mrf.mxu0 }
  0xdb   :  { %v324_v21 = vadd.f32 %v323_v18, %v127_v9  ;;  %v363_v39 = vsub.f32 0.0, %v329_v26  ;;  %v384_v55 = vmul.f32 1.442695, %v360_v46  ;;  %v82_v9 = vpop.permute.xlu1 %81 }
  0xdc   :  { %v1312_v20 = vpop.f32.mrf.mxu0  ;;  %v279_v11 = vadd.f32 %v1880_v0, %v82_v9 }
  0xdd   :  { %v339_v22 = vadd.f32 %v1312_v20, %v142_v7  ;;  %v362_v29 = vsub.f32 0.0, %v324_v21  ;;  %v390_v51 = vmul.f32 1.442695, %v363_v39  ;;  %v382_v7 = vmul.f32 1.442695, %v359_v58 }
  0xde   :  { %v333_v23 = vpop.f32.mrf.mxu0 }
  0xdf   :  { %v365_v24 = vsub.f32 0.0, %v339_v22  ;;  %v334_v27 = vadd.f32 %v333_v23, %v137_v2  ;;  %v388_v41 = vmul.f32 1.442695, %v362_v29  ;;  %v357_v2 = vsub.f32 0.0, %v299_v56 }
  0xe0   :  { %v1315_v28 = vpop.f32.mrf.mxu0 }
  0xe1   :  { %v349_v30 = vadd.f32 %v1315_v28, %v152_v4  ;;  %v364_v33 = vsub.f32 0.0, %v334_v27  ;;  %v394_v35 = vmul.f32 1.442695, %v365_v24  ;;  %v77_v4 = vpop.permute.xlu0 %76  ;;  %v378_v13 = vmul.f32 1.442695, %v357_v2 }
  0xe2   :  { %v343_v34 = vpop.f32.mrf.mxu0  ;;  %v274_v5 = vadd.f32 %v1882_v1, %v77_v4  ;;  %v353_v1 = vsub.f32 0.0, %v279_v11  ;;  %v1400_v11 = vld [vmem:[%s1948_s3 + $0x10] sm:$0xff]  }
  0xe3   :  { %v367_v36 = vsub.f32 0.0, %v349_v30  ;;  %v344_v37 = vadd.f32 %v343_v34, %v147_v63  ;;  %v392_v40 = vmul.f32 1.442695, %v364_v33  ;;  %v289_v63 = vadd.f32 %v1884_v3, %v92_v57 }
  0xe4   :  { %v352_v3 = vsub.f32 0.0, %v274_v5  ;;  %v370_v26 = vmul.f32 1.442695, %v353_v1 }
  0xe5   :  { %v398_v42 = vmul.f32 1.442695, %v367_v36  ;;  %v366_v43 = vsub.f32 0.0, %v344_v37  ;;  %1412 = vpow2.f32 %v392_v40  ;;  %v355_v12 = vsub.f32 0.0, %v289_v63 }
  0xe6   :  { %1414 = vpow2.f32 %v394_v35  ;;  %v368_v0 = vmul.f32 1.442695, %v352_v3  ;;  %v1406_v3 = vld [vmem:[%s1950_s5] sm:$0xff]  }
  0xe7   :  { %v396_v47 = vmul.f32 1.442695, %v366_v43  ;;  %1416 = vpow2.f32 %v398_v42  ;;  %v374_v20 = vmul.f32 1.442695, %v355_v12  ;;  %v1401_v12 = vld [vmem:[%s1948_s3 + $0x18] sm:$0xff]   ;;  %1364 = vmatprep.mubr.bf16.mxu0 %v1406_v3 }
  0xe8   :  { %1418 = vpow2.f32 %v388_v41 }
  0xe9   :  { %1420 = vpow2.f32 %v396_v47 }
  0xea   :  { %1422 = vpow2.f32 %v390_v51 }
  0xeb   :  { %1424 = vpow2.f32 %v384_v55 }
  0xec   :  { %1426 = vpow2.f32 %v386_v59 }
  0xed   :  { %1428 = vpow2.f32 %v380_v62 }
  0xee   :  { %1430 = vpow2.f32 %v382_v7 }
  0xef   :  { %1432 = vpow2.f32 %v372_v8 }
  0xf0   :  { %1434 = vpow2.f32 %v376_v10 }
  0xf1   :  { %1436 = vpow2.f32 %v378_v13  ;;  %v1402_v13 = vld [vmem:[%s1948_s3 + $0x20] sm:$0xff]  }
  0xf2   :  { %v1413_v6 = vpop.eup %1412 }
  0xf3   :  { %v1415_v14 = vpop.eup %1414  ;;  %v412_v15 = vadd.f32 1.0, %v1413_v6  ;;  %v1399_v6 = vld [vmem:[%s1948_s3 + $0x8] sm:$0xff]  }
  0xf4   :  { %v1417_v16 = vpop.eup %1416  ;;  %v413_v21 = vadd.f32 1.0, %v1415_v14  ;;  %v1403_v14 = vld [vmem:[%s1948_s3 + $0x28] sm:$0xff]  }
  0xf5   :  { %v1419_v17 = vpop.eup %1418  ;;  %v415_v18 = vadd.f32 1.0, %v1417_v16  ;;  %1438 = vrcp.f32 %v412_v15  ;;  %v1404_v15 = vld [vmem:[%s1948_s3 + $0x30] sm:$0xff]   ;;  %v1405_v16 = vld [vmem:[%s1948_s3 + $0x38] sm:$0xff]  }
  0xf6   :  { %v1421_v19 = vpop.eup %1420  ;;  %v410_v24 = vadd.f32 1.0, %v1419_v17  ;;  %v561_v17 = vpop.permute.xlu0 %560 }
  0xf7   :  { %v414_v22 = vadd.f32 1.0, %v1421_v19  ;;  %v1423_v23 = vpop.eup %1422  ;;  %1440 = vrcp.f32 %v415_v18  ;;  %v566_v18 = vpop.permute.xlu1 %565 }
  0xf8   :  { %v1425_v25 = vpop.eup %1424  ;;  %v411_v27 = vadd.f32 1.0, %v1423_v23 }
  0xf9   :  { %1442 = vrcp.f32 %v414_v22  ;;  %v1427_v28 = vpop.eup %1426  ;;  %v408_v29 = vadd.f32 1.0, %v1425_v25 }
  0xfa   :  { %1444 = vpow2.f32 %v374_v20  ;;  %v1429_v30 = vpop.eup %1428  ;;  %v409_v31 = vadd.f32 1.0, %v1427_v28  ;;  %v551_v20 = vpop.permute.xlu0 %550 }
  0xfb   :  { %1446 = vrcp.f32 %v413_v21  ;;  %v1431_v32 = vpop.eup %1430  ;;  %v406_v34 = vadd.f32 1.0, %v1429_v30  ;;  %v556_v22 = vpop.permute.xlu1 %555 }
  0xfc   :  { %1448 = vpow2.f32 %v368_v0  ;;  %v1433_v33 = vpop.eup %1432  ;;  %v407_v37 = vadd.f32 1.0, %v1431_v32 }
  0xfd   :  { %1450 = vrcp.f32 %v410_v24  ;;  %v1435_v35 = vpop.eup %1434  ;;  %v402_v47 = vadd.f32 1.0, %v1433_v33 }
  0xfe   :  { %1452 = vpow2.f32 %v370_v26  ;;  %v1437_v36 = vpop.eup %1436  ;;  %v404_v40 = vadd.f32 1.0, %v1435_v35  ;;  %v541_v24 = vpop.permute.xlu0 %540 }
  0xff   :  { %1454 = vrcp.f32 %v411_v27  ;;  %v405_v43 = vadd.f32 1.0, %v1437_v36  ;;  %v546_v26 = vpop.permute.xlu1 %545 }
 0x100   :  { %1456 = vrcp.f32 %v408_v29 }
 0x101   :  { %1458 = vrcp.f32 %v409_v31 }
 0x102   :  { %v1439_v38 = vpop.eup %1438  ;;  %1460 = vrcp.f32 %v406_v34  ;;  %v531_v29 = vpop.permute.xlu0 %530 }
 0x103   :  { %1462 = vrcp.f32 %v407_v37  ;;  %v536_v31 = vpop.permute.xlu1 %535 }
 0x104   :  { %v1441_v39 = vpop.eup %1440  ;;  %1464 = vrcp.f32 %v404_v40 }
 0x105   :  { %1466 = vrcp.f32 %v405_v43 }
 0x106   :  { %v1443_v41 = vpop.eup %1442  ;;  %1468 = vrcp.f32 %v402_v47  ;;  %v521_v34 = vpop.permute.xlu0 %520 }
 0x107   :  { %v1445_v42 = vpop.eup %1444  ;;  %v471_v44 = vpack.c.bf16 %v1441_v39, %v1443_v41  ;;  %v526_v37 = vpop.permute.xlu1 %525 }
 0x108   :  { %v1447_v45 = vpop.eup %1446  ;;  %v403_v51 = vadd.f32 1.0, %v1445_v42 }
 0x109   :  { %v1449_v46 = vpop.eup %1448  ;;  %1316 = vmatprep.subr.bf16.mxu1 %v471_v44  ;;  %v470_v48 = vpack.c.bf16 %v1447_v45, %v1439_v38 }
 0x10a   :  { %v1451_v49 = vpop.eup %1450  ;;  %1317 = vmatpush3.bf16.msra.mxu1 %v471_v44  ;;  %v400_v53 = vadd.f32 1.0, %v1449_v46  ;;  %1470 = vrcp.f32 %v403_v51  ;;  %v511_v44 = vpop.permute.xlu0 %510 }
 0x10b   :  { %v1453_v50 = vpop.eup %1452  ;;  %1318 = vmatprep.subr.bf16.mxu1 %v470_v48  ;;  %v516_v51 = vpop.permute.xlu1 %515 }
 0x10c   :  { %v1455_v52 = vpop.eup %1454  ;;  %v401_v56 = vadd.f32 1.0, %v1453_v50  ;;  %1472 = vrcp.f32 %v400_v53 }
 0x10d   :  { %v469_v54 = vpack.c.bf16 %v1455_v52, %v1451_v49  ;;  %v1457_v55 = vpop.eup %1456 }
 0x10e   :  { %1319 = vmatpush3.bf16.msra.mxu1 %v470_v48  ;;  %v1459_v57 = vpop.eup %1458  ;;  %1474 = vrcp.f32 %v401_v56 }
 0x10f   :  { %1320 = vmatprep.subr.bf16.mxu1 %v469_v54  ;;  %v468_v58 = vpack.c.bf16 %v1459_v57, %v1457_v55  ;;  %v1461_v59 = vpop.eup %1460 }
 0x110   :  { %v1463_v60 = vpop.eup %1462 }
 0x111   :  { %v467_v61 = vpack.c.bf16 %v1463_v60, %v1461_v59  ;;  %v1465_v62 = vpop.eup %1464 }
 0x112   :  { %1321 = vmatpush3.bf16.msra.mxu1 %v469_v54  ;;  %v1467_v63 = vpop.eup %1466 }
 0x113   :  { %1322 = vmatprep.subr.bf16.mxu1 %v468_v58  ;;  %v466_v2 = vpack.c.bf16 %v1467_v63, %v1465_v62  ;;  %v1469_v4 = vpop.eup %1468 }
 0x116   :  { %1323 = vmatpush3.bf16.msra.mxu1 %v468_v58 }
 0x117   :  { %1324 = vmatprep.subr.bf16.mxu1 %v467_v61  ;;  %v1471_v7 = vpop.eup %1470 }
 0x118   :  { %v465_v5 = vpack.c.bf16 %v1471_v7, %v1469_v4 }
 0x119   :  { %v1473_v8 = vpop.eup %1472 }
 0x11a   :  { %1325 = vmatpush3.bf16.msra.mxu1 %v467_v61 }
 0x11b   :  { %1326 = vmatprep.subr.bf16.mxu1 %v466_v2  ;;  %v1475_v9 = vpop.eup %1474 }
 0x11c   :  { %v464_v10 = vpack.c.bf16 %v1475_v9, %v1473_v8  ;;  %v506_v9 = vpop.permute.xlu1 %505 }
 0x11e   :  { %1327 = vmatpush3.bf16.msra.mxu1 %v466_v2  ;;  %v501_v2 = vpop.permute.xlu0 %500 }
 0x11f   :  { %1328 = vmatprep.subr.bf16.mxu1 %v465_v5 }
 0x122   :  { %1329 = vmatpush3.bf16.msra.mxu1 %v465_v5 }
 0x123   :  { %1330 = vmatprep.subr.bf16.mxu1 %v464_v10 }
 0x126   :  { %1331 = vmatpush3.bf16.msra.mxu1 %v464_v10 }
 0x129   :  { %1333 = vmatmul.mubr.bf16.vlgmr.msra.gmra.mxu1 %v1399_v6 }
 0x12a   :  { %1336 = vmatprep.mubr.bf16.mxu1 %v1400_v11 }
 0x131   :  { %1337 = vmatmul.mubr.bf16.gmra.mxu1 %v1401_v12 }
 0x132   :  { %1340 = vmatprep.mubr.bf16.mxu1 %v1402_v13 }
 0x139   :  { %1341 = vmatmul.mubr.bf16.gmra.mxu1 %v1403_v14 }
 0x13a   :  { %1344 = vmatprep.mubr.bf16.mxu1 %v1404_v15 }
 0x141   :  { %1345 = vmatmul.mubr.bf16.gmra.mxu1 %v1405_v16 }
 0x1e9   :  { %v1334_v19 = vpop.f32.mrf.mxu1 }
 0x1ea   :  { %v659_v5 = vadd.f32 %v1334_v19, %v501_v2 }
 0x1eb   :  { %v1913_v1 = vpop.f32.mrf.mxu1 }
 0x1ec   :  { %v715_v16 = vsub.f32 0.0, %v659_v5 }
 0x1ed   :  { %v1335_v21 = vpop.f32.mrf.mxu1 }
 0x1ee   :  { %v662_v12 = vadd.f32 %v1335_v21, %v506_v9 }
 0x1ef   :  { %v1915_v23 = vpop.f32.mrf.mxu1 }
 0x1f1   :  { %v1338_v0 = vpop.f32.mrf.mxu1 }
 0x1f2   :  { %v675_v4 = vadd.f32 %v1338_v0, %v521_v34  ;;  %v733_v0 = vmul.f32 1.442695, %v715_v16 }
 0x1f3   :  { %v666_v25 = vpop.f32.mrf.mxu1 }
 0x1f4   :  { %v719_v13 = vsub.f32 0.0, %v675_v4  ;;  %v667_v14 = vadd.f32 %v666_v25, %v511_v44 }
 0x1f5   :  { %v1339_v27 = vpop.f32.mrf.mxu1 }
 0x1f6   :  { %v678_v58 = vadd.f32 %v1339_v27, %v526_v37  ;;  %v741_v19 = vmul.f32 1.442695, %v719_v13 }
 0x1f7   :  { %v669_v28 = vpop.f32.mrf.mxu1 }
 0x1f8   :  { %v720_v10 = vsub.f32 0.0, %v678_v58  ;;  %v670_v6 = vadd.f32 %v669_v28, %v516_v51 }
 0x1f9   :  { %v1342_v30 = vpop.f32.mrf.mxu1 }
 0x1fa   :  { %v691_v39 = vadd.f32 %v1342_v30, %v541_v24  ;;  %v743_v3 = vmul.f32 1.442695, %v720_v10 }
 0x1fb   :  { %v682_v32 = vpop.f32.mrf.mxu1 }
 0x1fc   :  { %v723_v48 = vsub.f32 0.0, %v691_v39  ;;  %v683_v52 = vadd.f32 %v682_v32, %v531_v29 }
 0x1fd   :  { %v1343_v33 = vpop.f32.mrf.mxu1 }
 0x1fe   :  { %v694_v36 = vadd.f32 %v1343_v33, %v546_v26  ;;  %v749_v61 = vmul.f32 1.442695, %v723_v48  ;;  %v721_v7 = vsub.f32 0.0, %v683_v52  ;;  %v491_v26 = vpop.permute.xlu0 %490 }
 0x1ff   :  { %v685_v35 = vpop.f32.mrf.mxu1  ;;  %v651_v25 = vadd.f32 %v1913_v1, %v491_v26 }
 0x200   :  { %v724_v42 = vsub.f32 0.0, %v694_v36  ;;  %v686_v45 = vadd.f32 %v685_v35, %v536_v31  ;;  %v745_v15 = vmul.f32 1.442695, %v721_v7 }
 0x201   :  { %v1346_v38 = vpop.f32.mrf.mxu1  ;;  %v713_v35 = vsub.f32 0.0, %v651_v25  ;;  %v1409_v25 = vld [vmem:[%s1950_s5 + $0x18] sm:$0xff]  }
 0x202   :  { %v707_v40 = vadd.f32 %v1346_v38, %v561_v17  ;;  %v751_v55 = vmul.f32 1.442695, %v724_v42  ;;  %v722_v59 = vsub.f32 0.0, %v686_v45  ;;  %v718_v17 = vsub.f32 0.0, %v670_v6 }
 0x203   :  { %v698_v41 = vpop.f32.mrf.mxu1  ;;  %v729_v42 = vmul.f32 1.442695, %v713_v35 }
 0x204   :  { %v727_v43 = vsub.f32 0.0, %v707_v40  ;;  %v699_v46 = vadd.f32 %v698_v41, %v551_v20  ;;  %v747_v11 = vmul.f32 1.442695, %v722_v59  ;;  %v496_v20 = vpop.permute.xlu1 %495  ;;  %v739_v21 = vmul.f32 1.442695, %v718_v17 }
 0x205   :  { %v1347_v47 = vpop.f32.mrf.mxu1  ;;  %v654_v24 = vadd.f32 %v1915_v23, %v496_v20 }
 0x206   :  { %v757_v49 = vmul.f32 1.442695, %v727_v43  ;;  %v710_v50 = vadd.f32 %v1347_v47, %v566_v18  ;;  %v725_v53 = vsub.f32 0.0, %v699_v46  ;;  %v716_v18 = vsub.f32 0.0, %v662_v12 }
 0x207   :  { %v701_v54 = vpop.f32.mrf.mxu1  ;;  %v714_v31 = vsub.f32 0.0, %v654_v24 }
 0x208   :  { %v728_v56 = vsub.f32 0.0, %v710_v50  ;;  %v702_v57 = vadd.f32 %v701_v54, %v556_v22  ;;  %1476 = vpow2.f32 %v757_v49  ;;  %v753_v60 = vmul.f32 1.442695, %v725_v53 }
 0x209   :  { %v717_v22 = vsub.f32 0.0, %v667_v14  ;;  %v735_v28 = vmul.f32 1.442695, %v716_v18  ;;  %v731_v39 = vmul.f32 1.442695, %v714_v31 }
 0x20a   :  { %v759_v62 = vmul.f32 1.442695, %v728_v56  ;;  %v726_v63 = vsub.f32 0.0, %v702_v57  ;;  %1478 = vpow2.f32 %v753_v60 }
 0x20b   :  { %1480 = vpow2.f32 %v751_v55  ;;  %v737_v29 = vmul.f32 1.442695, %v717_v22 }
 0x20c   :  { %v755_v8 = vmul.f32 1.442695, %v726_v63  ;;  %1482 = vpow2.f32 %v759_v62 }
 0x20d   :  { %1484 = vpow2.f32 %v749_v61 }
 0x20e   :  { %1486 = vpow2.f32 %v755_v8 }
 0x20f   :  { %1488 = vpow2.f32 %v747_v11 }
 0x210   :  { %1490 = vpow2.f32 %v745_v15 }
 0x211   :  { %1492 = vpow2.f32 %v743_v3 }
 0x212   :  { %1494 = vpow2.f32 %v741_v19 }
 0x213   :  { %1496 = vpow2.f32 %v733_v0 }
 0x214   :  { %1498 = vpow2.f32 %v739_v21  ;;  %v1407_v21 = vld [vmem:[%s1950_s5 + $0x8] sm:$0xff]  }
 0x215   :  { %v1477_v27 = vpop.eup %1476  ;;  %1500 = vpow2.f32 %v735_v28  ;;  %v1410_v28 = vld [vmem:[%s1952_s7] sm:$0xff]  }
 0x216   :  { %v775_v32 = vadd.f32 1.0, %v1477_v27  ;;  %1502 = vpow2.f32 %v737_v29  ;;  %v1408_v27 = vld [vmem:[%s1950_s5 + $0x10] sm:$0xff]   ;;  %v871_v29 = vpop.permute.xlu1 %870 }
 0x217   :  { %v1479_v30 = vpop.eup %1478 }
 0x218   :  { %v1481_v33 = vpop.eup %1480  ;;  %v773_v36 = vadd.f32 1.0, %v1479_v30  ;;  %1504 = vrcp.f32 %v775_v32  ;;  %v866_v30 = vpop.permute.xlu0 %865 }
 0x219   :  { %v1483_v34 = vpop.eup %1482  ;;  %v772_v1 = vadd.f32 1.0, %v1481_v33 }
 0x21a   :  { %v1485_v23 = vpop.eup %1484  ;;  %v776_v37 = vadd.f32 1.0, %v1483_v34  ;;  %v861_v31 = vpop.permute.xlu1 %860 }
 0x21b   :  { %v1487_v38 = vpop.eup %1486  ;;  %v771_v43 = vadd.f32 1.0, %v1485_v23 }
 0x21c   :  { %1506 = vrcp.f32 %v776_v37  ;;  %v774_v40 = vadd.f32 1.0, %v1487_v38  ;;  %v1489_v41 = vpop.eup %1488  ;;  %v856_v32 = vpop.permute.xlu0 %855 }
 0x21d   :  { %1508 = vrcp.f32 %v773_v36  ;;  %v1491_v44 = vpop.eup %1490  ;;  %v770_v45 = vadd.f32 1.0, %v1489_v41 }
 0x21e   :  { %1510 = vrcp.f32 %v774_v40  ;;  %v1493_v46 = vpop.eup %1492  ;;  %v769_v47 = vadd.f32 1.0, %v1491_v44  ;;  %v851_v35 = vpop.permute.xlu1 %850 }
 0x21f   :  { %1512 = vpow2.f32 %v731_v39  ;;  %v1495_v48 = vpop.eup %1494  ;;  %v768_v50 = vadd.f32 1.0, %v1493_v46 }
 0x220   :  { %1514 = vrcp.f32 %v772_v1  ;;  %v1497_v49 = vpop.eup %1496  ;;  %v767_v53 = vadd.f32 1.0, %v1495_v48  ;;  %v846_v23 = vpop.permute.xlu0 %845 }
 0x221   :  { %1516 = vpow2.f32 %v729_v42  ;;  %v1499_v51 = vpop.eup %1498  ;;  %v763_v5 = vadd.f32 1.0, %v1497_v49 }
 0x222   :  { %1518 = vrcp.f32 %v771_v43  ;;  %v1501_v52 = vpop.eup %1500  ;;  %v766_v56 = vadd.f32 1.0, %v1499_v51  ;;  %v841_v40 = vpop.permute.xlu1 %840 }
 0x223   :  { %1520 = vrcp.f32 %v770_v45  ;;  %v1503_v54 = vpop.eup %1502  ;;  %v764_v63 = vadd.f32 1.0, %v1501_v52 }
 0x224   :  { %1522 = vrcp.f32 %v769_v47  ;;  %v765_v59 = vadd.f32 1.0, %v1503_v54  ;;  %v836_v47 = vpop.permute.xlu0 %835 }
 0x225   :  { %v1505_v55 = vpop.eup %1504  ;;  %1524 = vrcp.f32 %v768_v50 }
 0x226   :  { %1526 = vrcp.f32 %v767_v53 }
 0x227   :  { %1528 = vrcp.f32 %v766_v56 }
 0x228   :  { %1530 = vrcp.f32 %v765_v59 }
 0x229   :  { %v1507_v57 = vpop.eup %1506  ;;  %1532 = vrcp.f32 %v764_v63 }
 0x22a   :  { %v1509_v58 = vpop.eup %1508  ;;  %v824_v60 = vpack.c.bf16 %v1507_v57, %v1505_v55  ;;  %1534 = vrcp.f32 %v763_v5 }
 0x22b   :  { %v1511_v61 = vpop.eup %1510 }
 0x22c   :  { %v1513_v62 = vpop.eup %1512  ;;  %1348 = vmatprep.subr.bf16.mxu0 %v824_v60  ;;  %v823_v2 = vpack.c.bf16 %v1511_v61, %v1509_v58 }
 0x22d   :  { %v1515_v4 = vpop.eup %1514  ;;  %1349 = vmatpush3.bf16.msra.mxu0 %v824_v60  ;;  %v762_v9 = vadd.f32 1.0, %v1513_v62 }
 0x22e   :  { %v1517_v7 = vpop.eup %1516  ;;  %1350 = vmatprep.subr.bf16.mxu0 %v823_v2 }
 0x22f   :  { %v1519_v8 = vpop.eup %1518  ;;  %v761_v11 = vadd.f32 1.0, %v1517_v7  ;;  %1536 = vrcp.f32 %v762_v9 }
 0x230   :  { %v822_v10 = vpack.c.bf16 %v1515_v4, %v1519_v8  ;;  %v1521_v6 = vpop.eup %1520 }
 0x231   :  { %1351 = vmatpush3.bf16.msra.mxu0 %v823_v2  ;;  %v1523_v12 = vpop.eup %1522  ;;  %1538 = vrcp.f32 %v761_v11 }
 0x232   :  { %1352 = vmatprep.subr.bf16.mxu0 %v822_v10  ;;  %v821_v13 = vpack.c.bf16 %v1521_v6, %v1523_v12  ;;  %v1525_v14 = vpop.eup %1524 }
 0x233   :  { %v1527_v15 = vpop.eup %1526 }
 0x234   :  { %v820_v16 = vpack.c.bf16 %v1525_v14, %v1527_v15  ;;  %v1529_v3 = vpop.eup %1528 }
 0x235   :  { %1353 = vmatpush3.bf16.msra.mxu0 %v822_v10  ;;  %v1531_v17 = vpop.eup %1530 }
 0x236   :  { %1354 = vmatprep.subr.bf16.mxu0 %v821_v13  ;;  %v819_v18 = vpack.c.bf16 %v1529_v3, %v1531_v17  ;;  %v1533_v20 = vpop.eup %1532 }
 0x237   :  { %v1535_v19 = vpop.eup %1534 }
 0x238   :  { %v818_v22 = vpack.c.bf16 %v1533_v20, %v1535_v19 }
 0x239   :  { %1355 = vmatpush3.bf16.msra.mxu0 %v821_v13 }
 0x23a   :  { %1356 = vmatprep.subr.bf16.mxu0 %v820_v16 }
 0x23c   :  { %v1537_v0 = vpop.eup %1536 }
 0x23d   :  { %1357 = vmatpush3.bf16.msra.mxu0 %v820_v16 }
 0x23e   :  { %1358 = vmatprep.subr.bf16.mxu0 %v819_v18  ;;  %v1539_v24 = vpop.eup %1538 }
 0x23f   :  { %v817_v26 = vpack.c.bf16 %v1537_v0, %v1539_v24 }
 0x241   :  { %1359 = vmatpush3.bf16.msra.mxu0 %v819_v18 }
 0x242   :  { %1360 = vmatprep.subr.bf16.mxu0 %v818_v22 }
 0x245   :  { %1361 = vmatpush3.bf16.msra.mxu0 %v818_v22 }
 0x246   :  { %1362 = vmatprep.subr.bf16.mxu0 %v817_v26 }
 0x249   :  { %1363 = vmatpush3.bf16.msra.mxu0 %v817_v26 }
 0x24c   :  { %1365 = vmatmul.mubr.bf16.vlgmr.msra.gmra.mxu0 %v1407_v21 }
 0x24d   :  { %1368 = vmatprep.mubr.bf16.mxu0 %v1408_v27 }
 0x254   :  { %1369 = vmatmul.mubr.bf16.gmra.mxu0 %v1409_v25 }
 0x255   :  { %1380 = vmatprep.mubr.msk.bf16.mxu0 %vm1052_vm2, %v1410_v28 }
 0x30c   :  { %v1366_v33 = vpop.f32.mrf.mxu0 }
 0x30d   :  { %v940_v39 = vadd.f32 %v1366_v33, %v846_v23  ;;  %v1411_v33 = vld [vmem:[%s1952_s7 + $0x8] sm:$0xff]  }
 0x30e   :  { %v931_v34 = vpop.f32.mrf.mxu0 }
 0x30f   :  { %v964_v48 = vsub.f32 0.0, %v940_v39  ;;  %v932_v50 = vadd.f32 %v931_v34, %v836_v47  ;;  %v1615_v34 = vmov 0.0  }
 0x310   :  { %v1367_v36 = vpop.f32.mrf.mxu0 }
 0x311   :  { %v943_v37 = vadd.f32 %v1367_v36, %v851_v35  ;;  %v974_v60 = vmul.f32 1.442695, %v964_v48  ;;  %v962_v61 = vsub.f32 0.0, %v932_v50  ;;  %v1035_v35 = vpop.permute.xlu0 %1034  ;;  %v1040_v36 = vpop.permute.xlu1 %1039 }
 0x312   :  { %v934_v38 = vpop.f32.mrf.mxu0 }
 0x313   :  { %v965_v42 = vsub.f32 0.0, %v943_v37  ;;  %v935_v43 = vadd.f32 %v934_v38, %v841_v40  ;;  %v970_v7 = vmul.f32 1.442695, %v962_v61 }
 0x314   :  { %v1370_v1 = vpop.f32.mrf.mxu0 }
 0x315   :  { %v956_v41 = vadd.f32 %v1370_v1, %v866_v30  ;;  %v976_v54 = vmul.f32 1.442695, %v965_v42  ;;  %v963_v55 = vsub.f32 0.0, %v935_v43  ;;  %v1025_v38 = vpop.permute.xlu0 %1024 }
 0x316   :  { %v947_v44 = vpop.f32.mrf.mxu0 }
 0x317   :  { %v968_v45 = vsub.f32 0.0, %v956_v41  ;;  %v948_v46 = vadd.f32 %v947_v44, %v856_v32  ;;  %v972_v2 = vmul.f32 1.442695, %v963_v55 }
 0x318   :  { %v1371_v49 = vpop.f32.mrf.mxu0 }
 0x319   :  { %v982_v51 = vmul.f32 1.442695, %v968_v45  ;;  %v966_v52 = vsub.f32 0.0, %v948_v46  ;;  %v959_v53 = vadd.f32 %v1371_v49, %v871_v29  ;;  %v1030_v45 = vpop.permute.xlu1 %1029 }
 0x31a   :  { %v950_v56 = vpop.f32.mrf.mxu0 }
 0x31b   :  { %1540 = vpow2.f32 %v982_v51  ;;  %v978_v57 = vmul.f32 1.442695, %v966_v52  ;;  %v969_v58 = vsub.f32 0.0, %v959_v53  ;;  %v951_v59 = vadd.f32 %v950_v56, %v861_v31 }
 0x31d   :  { %1542 = vpow2.f32 %v978_v57  ;;  %v984_v62 = vmul.f32 1.442695, %v969_v58  ;;  %v967_v63 = vsub.f32 0.0, %v951_v59 }
 0x31e   :  { %1544 = vpow2.f32 %v976_v54 }
 0x31f   :  { %1546 = vpow2.f32 %v984_v62  ;;  %v980_v4 = vmul.f32 1.442695, %v967_v63 }
 0x320   :  { %1548 = vpow2.f32 %v974_v60 }
 0x321   :  { %1550 = vpow2.f32 %v980_v4 }
 0x322   :  { %1552 = vpow2.f32 %v972_v2 }
 0x323   :  { %1554 = vpow2.f32 %v970_v7 }
 0x328   :  { %v1541_v5 = vpop.eup %1540 }
 0x329   :  { %v992_v9 = vadd.f32 1.0, %v1541_v5  ;;  %v1132_v5 = vld [vmem:[%s1954_s9] sm:$0x1]  ;;  %s1592_s9 = scalar_lea.vmem %s1195_s15, 16 }
 0x32a   :  { %v1543_v8 = vpop.eup %1542  ;;  %p1593_p0 = scmp.ne.s32.totalorder %s1195_s15, %s1592_s9  ;;  %p1598_p2 = scmp.lt.s32.totalorder %s1596_s16, %s1592_s9 }
 0x32b   :  { %v1545_v10 = vpop.eup %1544  ;;  %v990_v11 = vadd.f32 1.0, %v1543_v8  ;;  %1556 = vrcp.f32 %v992_v9  ;;  %v1136_v8 = vstv %s1955_s10 }
 0x32c   :  { %v1547_v6 = vpop.eup %1546  ;;  %v989_v15 = vadd.f32 1.0, %v1545_v10  ;;  %p1599_p3 = por %p1598_p2, %p1597_p1 }
 0x32d   :  { %v1549_v12 = vpop.eup %1548  ;;  %v993_v13 = vadd.f32 1.0, %v1547_v6 }
 0x32e   :  { %v1551_v14 = vpop.eup %1550  ;;  %v988_v17 = vadd.f32 1.0, %v1549_v12  ;;  %p1600_p4 = pnand %p1599_p3, %p1593_p0 }
 0x32f   :  { %1558 = vrcp.f32 %v993_v13  ;;  %v991_v16 = vadd.f32 1.0, %v1551_v14  ;;  %v1553_v3 = vpop.eup %1552 }
 0x330   :  { %1560 = vrcp.f32 %v990_v11  ;;  %v1555_v18 = vpop.eup %1554  ;;  %v987_v20 = vadd.f32 1.0, %v1553_v3 }
 0x331   :  { %1562 = vrcp.f32 %v991_v16  ;;  %v986_v19 = vadd.f32 1.0, %v1555_v18 }
 0x332   :  { %1564 = vrcp.f32 %v989_v15 }
 0x333   :  { %1566 = vrcp.f32 %v988_v17 }
 0x334   :  { %1568 = vrcp.f32 %v987_v20 }
 0x335   :  { %1570 = vrcp.f32 %v986_v19 }
 0x338   :  { %v1557_v22 = vpop.eup %1556 }
 0x33c   :  { %v1559_v0 = vpop.eup %1558 }
 0x33d   :  { %v1561_v24 = vpop.eup %1560  ;;  %v1017_v26 = vpack.c.bf16 %v1559_v0, %v1557_v22 }
 0x33e   :  { %v1563_v21 = vpop.eup %1562 }
 0x33f   :  { %1372 = vmatprep.subr.bf16.mxu0 %v1017_v26  ;;  %v1016_v27 = vpack.c.bf16 %v1563_v21, %v1561_v24  ;;  %v1565_v25 = vpop.eup %1564 }
 0x340   :  { %1373 = vmatpush3.bf16.msra.mxu0 %v1017_v26  ;;  %v1567_v28 = vpop.eup %1566 }
 0x341   :  { %1374 = vmatprep.subr.bf16.mxu0 %v1016_v27  ;;  %v1015_v29 = vpack.c.bf16 %v1565_v25, %v1567_v28  ;;  %v1569_v30 = vpop.eup %1568 }
 0x342   :  { %v1571_v31 = vpop.eup %1570 }
 0x343   :  { %v1014_v32 = vpack.c.bf16 %v1569_v30, %v1571_v31 }
 0x344   :  { %1375 = vmatpush3.bf16.msra.mxu0 %v1016_v27 }
 0x345   :  { %1376 = vmatprep.subr.bf16.mxu0 %v1015_v29 }
 0x348   :  { %1377 = vmatpush3.bf16.msra.mxu0 %v1015_v29 }
 0x349   :  { %1378 = vmatprep.subr.bf16.mxu0 %v1014_v32 }
 0x34c   :  { %1379 = vmatpush3.bf16.msra.mxu0 %v1014_v32 }
 0x34d   :  { %1384 = vmatprep.subr.bf16.mxu0 %v1615_v34 }
 0x34f   :  { %1381 = vmatmul.mubr.msk.bf16.vlgmr.msra.gmra.mxu0 %vm1052_vm2, %v1411_v33 }
 0x350   :  { %1388 = vmatprep.mubr.msk.bf16.mxu0 %vm1616_vm3, %v1615_v34 }
 0x40f   :  { %v1382_v23 = vpop.f32.mrf.mxu0 }
 0x410   :  { %v1102_v37 = vadd.f32 %v1382_v23, %v1035_v35 }
 0x411   :  { %v1093_v39 = vpop.f32.mrf.mxu0 }
 0x412   :  { %v1110_v1 = vsub.f32 0.0, %v1102_v37  ;;  %v1094_v40 = vadd.f32 %v1093_v39, %v1025_v38 }
 0x413   :  { %v1383_v41 = vpop.f32.mrf.mxu0 }
 0x414   :  { %v1116_v42 = vmul.f32 1.442695, %v1110_v1  ;;  %v1108_v43 = vsub.f32 0.0, %v1094_v40  ;;  %v1105_v44 = vadd.f32 %v1383_v41, %v1040_v36 }
 0x415   :  { %v1096_v46 = vpop.f32.mrf.mxu0 }
 0x416   :  { %1572 = vpow2.f32 %v1116_v42  ;;  %v1112_v47 = vmul.f32 1.442695, %v1108_v43  ;;  %v1111_v48 = vsub.f32 0.0, %v1105_v44  ;;  %v1097_v49 = vadd.f32 %v1096_v46, %v1030_v45 }
 0x418   :  { %v1118_v50 = vmul.f32 1.442695, %v1111_v48  ;;  %v1109_v51 = vsub.f32 0.0, %v1097_v49  ;;  %1574 = vpow2.f32 %v1112_v47 }
 0x41a   :  { %1576 = vpow2.f32 %v1118_v50  ;;  %v1114_v52 = vmul.f32 1.442695, %v1109_v51 }
 0x41c   :  { %1578 = vpow2.f32 %v1114_v52 }
 0x423   :  { %v1573_v53 = vpop.eup %1572 }
 0x424   :  { %v1122_v54 = vadd.f32 1.0, %v1573_v53 }
 0x425   :  { %v1575_v55 = vpop.eup %1574 }
 0x426   :  { %1580 = vrcp.f32 %v1122_v54  ;;  %v1120_v59 = vadd.f32 1.0, %v1575_v55 }
 0x427   :  { %v1577_v56 = vpop.eup %1576 }
 0x428   :  { %v1123_v57 = vadd.f32 1.0, %v1577_v56 }
 0x429   :  { %v1579_v58 = vpop.eup %1578 }
 0x42a   :  { %1582 = vrcp.f32 %v1123_v57  ;;  %v1121_v60 = vadd.f32 1.0, %v1579_v58 }
 0x42c   :  { %1584 = vrcp.f32 %v1121_v60 }
 0x42d   :  { %1586 = vrcp.f32 %v1120_v59 }
 0x433   :  { %v1581_v61 = vpop.eup %1580 }
 0x437   :  { %v1583_v62 = vpop.eup %1582 }
 0x438   :  { %v1134_v63 = vpack.c.bf16 %v1583_v62, %v1581_v61 }
 0x439   :  { %v1585_v2 = vpop.eup %1584 }
 0x43a   :  { %1385 = vmatpush3.bf16.msra.mxu0 %v1134_v63  ;;  %v1587_v4 = vpop.eup %1586 }
 0x43b   :  { %1386 = vmatprep.subr.bf16.mxu0 %v1615_v34  ;;  %v1133_v7 = vpack.c.bf16 %v1585_v2, %v1587_v4 }
 0x43e   :  { %1387 = vmatpush3.bf16.msra.mxu0 %v1133_v7 }
 0x441   :  { %1389 = vmatmul.mubr.msk.bf16.vlgmr.msra.gmra.mxu0 %vm1137_vm4, %v1132_v5 }
 0x501   :  { %v1175_v9 = vpop.f32.mrf.mxu0 }
 0x502   :  { %v1176_v10 = vadd.f32 %v1175_v9, %v1136_v8 }
 0x503   :  { %v1390_v6 = vpop.f32.mrf.mxu0 }
 0x504   :  { %v1181_v11 = vsub.f32 0.0, %v1176_v10 }
 0x505   :  { %v1178_v12 = vpop.f32.mrf.mxu0 }
 0x506   :  { %v1182_v13 = vmul.f32 1.442695, %v1181_v11 }
 0x507   :  { %v1391_v14 = vpop.f32.mrf.mxu0 }
 0x508   :  { %1588 = vpow2.f32 %v1182_v13 }
 0x515   :  { %v1589_v15 = vpop.eup %1588 }
 0x516   :  { %v1184_v16 = vadd.f32 1.0, %v1589_v15 }
 0x518   :  { %1590 = vrcp.f32 %v1184_v16 }
 0x525   :  { %v1591_v3 = vpop.eup %1590 }
 0x526   :  { %1187 = vst [vmem:[#allocation3] sm:$0x1] %v1591_v3 }
 0x527   :  { %1603 = shalt.err (!%p1600_p4)
}
 0x528   :  { %1197 = dma.vmem_to_hbm [thread:$0]  %s1195_s15, 16, %s1956_s11, [#allocation4]  }
 0x529   :  { %1612 = dma.done.wait [#allocation4], 16  }
 0x52a   :  { %1613 = vsyncadd [#allocation4], 4294967280 }
 0x52b   :  { %1201 = vsyncpa [#allocation4], 1 }

</bundles_post_ra>
